<compile_context>
chip_gen: v7x
topology: tpu7x:2x2x1
jax: 0.10.0
libtpu: 0.0.40
codegen_flags: <defaults>
</compile_context>

<pallas_src>
import jax
import jax.numpy as jnp
from jax.experimental import pallas as pl
from jax.experimental.pallas import tpu as pltpu


def _residual_add_kernel(y_ref, x_ref, o_ref):
    # out = fn(x) + x  (elementwise, whole tile at once)
    o_ref[...] = y_ref[...] + x_ref[...]


def residual_add(y, x, *, target_block_bytes=2 << 20):
    """Elementwise y + x via a batch-tiled Pallas kernel. Any shape/dtype."""
    assert y.shape == x.shape, (y.shape, x.shape)
    assert y.dtype == x.dtype, (y.dtype, x.dtype)

    orig_shape = x.shape
    # Flatten to (rows, D): last dim stays on lanes (lane-dense output),
    # everything else becomes the tiled "row" axis.
    d = orig_shape[-1] if x.ndim >= 1 else 1
    rows = max(1, x.size // d)
    x2 = x.reshape(rows, d)
    y2 = y.reshape(rows, d)

    bpe = jnp.dtype(x.dtype).itemsize
    # Pick the largest row tile that keeps each block around target_block_bytes.
    # (2 inputs + 1 output) x 2 pipeline buffers x 2 MiB ~= 12 MiB of VMEM,
    # comfortably inside the scoped limit on v5e/v6e/v7x.
    max_rows = max(8, target_block_bytes // max(1, d * bpe))
    if rows <= max_rows:
        tile_rows = rows                      # single block along rows
    else:
        tile_rows = (max_rows // 8) * 8       # multiple of 8 (sublane tiling)

    grid = (pl.cdiv(rows, tile_rows),)

    out = pl.pallas_call(
        _residual_add_kernel,
        out_shape=jax.ShapeDtypeStruct((rows, d), x.dtype),
        grid=grid,
        in_specs=[
            pl.BlockSpec((tile_rows, d), lambda i: (i, 0)),
            pl.BlockSpec((tile_rows, d), lambda i: (i, 0)),
        ],
        out_specs=pl.BlockSpec((tile_rows, d), lambda i: (i, 0)),
        compiler_params=pltpu.CompilerParams(
            # Independent blocks -> shard across TensorCores (2 TCs on v7x).
            dimension_semantics=("parallel",),
            # Raise the scoped VMEM limit above the v5e default (16 MiB) so
            # large tiles double-buffer cleanly; 48 MiB still fits v7x's
            # 64 MiB physical VMEM.
            vmem_limit_bytes=48 << 20,
        ),
    )(y2, x2)
    return out.reshape(orig_shape)


class Residual:
    """Pallas equivalent of the PyTorch Residual module: fn(x, **kwargs) + x."""

    def __init__(self, fn):
        self.fn = fn

    def __call__(self, x, **kwargs):
        # TODO(synk): `fn` is an arbitrary wrapped module and cannot be fused
        # generically; it runs as plain JAX and only the residual add is a
        # Pallas kernel.
        y = self.fn(x, **kwargs)
        return residual_add(y, x)


if __name__ == "__main__":
    key = jax.random.PRNGKey(0)
    kx, kw1, kw2 = jax.random.split(key, 3)

    # Transformer-ish small shapes: batch=2, seq=8, hidden=32.
    B, S, D, H = 2, 8, 32, 64
    x = jax.random.normal(kx, (B, S, D), dtype=jnp.float32)
    w1 = 0.1 * jax.random.normal(kw1, (D, H), dtype=jnp.float32)
    w2 = 0.1 * jax.random.normal(kw2, (H, D), dtype=jnp.float32)

    # A deterministic stand-in for the wrapped sub-module (feed-forward + GELU).
    def ff(t):
        return jax.nn.gelu(t @ w1) @ w2

    res_block = Residual(ff)
    out = jax.block_until_ready(res_block(x))

    ref = ff(x) + x
    assert out.shape == x.shape, (out.shape, x.shape)
    assert jnp.allclose(out, ref, rtol=1e-5, atol=1e-5), (
        float(jnp.max(jnp.abs(out - ref))))

    print("KERNEL_OK")
</pallas_src>

<mosaic_0001>
module attributes {stable_mosaic.version = 11 : i64} {
  func.func @_residual_add_kernel(%arg0: i32, %arg1: memref<16x32xf32, #tpu.memory_space<vmem>>, %arg2: memref<16x32xf32, #tpu.memory_space<vmem>>, %arg3: memref<16x32xf32, #tpu.memory_space<vmem>>) attributes {dimension_semantics = [#tpu.dimension_semantics<parallel>], iteration_bounds = array<i64: 1>, scalar_prefetch = 0 : i64, scratch_operands = 0 : i64, tpu.core_type = #tpu.core_type<tc>, window_params = [{transform_indices = @transform_0, window_bounds = array<i64: 16, 32>}, {transform_indices = @transform_1, window_bounds = array<i64: 16, 32>}, {transform_indices = @transform_2, window_bounds = array<i64: 16, 32>}]} {
    %c0 = arith.constant 0 : index
    %c0_0 = arith.constant 0 : index
    %0 = vector.load %arg1[%c0, %c0_0] : memref<16x32xf32, #tpu.memory_space<vmem>>, vector<16x32xf32>
    %c0_1 = arith.constant 0 : index
    %c0_2 = arith.constant 0 : index
    %1 = vector.load %arg2[%c0_1, %c0_2] : memref<16x32xf32, #tpu.memory_space<vmem>>, vector<16x32xf32>
    %2 = arith.addf %0, %1 : vector<16x32xf32>
    %c0_3 = arith.constant 0 : index
    %c0_4 = arith.constant 0 : index
    %3 = vector.load %arg3[%c0_3, %c0_4] : memref<16x32xf32, #tpu.memory_space<vmem>>, vector<16x32xf32>
    tpu.vector_store %arg3[%c0_3, %c0_4], %2 {strides = array<i32>} : memref<16x32xf32, #tpu.memory_space<vmem>>, vector<16x32xf32>,
    return
  }
  func.func @transform_0(%arg0: i32) -> (i32, i32) {
    %c0_i32 = arith.constant 0 : i32
    %c0_i32_0 = arith.constant 0 : i32
    return %arg0, %c0_i32 : i32, i32
  }
  func.func @transform_1(%arg0: i32) -> (i32, i32) {
    %c0_i32 = arith.constant 0 : i32
    %c0_i32_0 = arith.constant 0 : i32
    return %arg0, %c0_i32 : i32, i32
  }
  func.func @transform_2(%arg0: i32) -> (i32, i32) {
    %c0_i32 = arith.constant 0 : i32
    %c0_i32_0 = arith.constant 0 : i32
    return %arg0, %c0_i32 : i32, i32
  }
}

</mosaic_0001>

<bundles_post_ra>
// kernel: tpu_custom_call.1
= control target key start
LH: loop header
LB: loop body
LE: loop exit
PB: predicated region body
PF: predicated region fallthrough
CT: control target
= control target key end

     0   :  { %7 = vsyncpa [#allocation3], 0  ;;  %s209_s0 = inlined_call_operand.hbm [shape: f32[16,32], index: 0, kind: input, shape index: {}]   ;;  %s210_s1 = inlined_call_operand.hbm [shape: f32[16,32], index: 1, kind: input, shape index: {}]   ;;  %s211_s2 = inlined_call_operand.hbm [shape: f32[16,32], index: 2, kind: output, shape index: {}]  }
   0x1   :  { %8 = vsyncpa [#allocation6], 0 }
   0x2   :  { %9 = vsyncpa [#allocation4], 0  ;;  %s144_s9 = smov [#allocation2]   ;;  %s72_s13 = scalar_lea.hbm %s209_s0, 256 }
   0x3   :  { %s15_s10 = sshll.u32 %s144_s9, 4  ;;  %p73_p0 = scmp.ne.s32.totalorder %s209_s0, %s72_s13  ;;  %s16_s10 = int_to_ptr.vmem [resolvable:$true] %s15_s10 }
   0x4   :  { %p76_p1 = scmp.lt.u32.totalorder %s72_s13, %s209_s0 }
   0x6   :  { %p78_p2 = pnand %p76_p1, %p73_p0 }
   0x8   :  { %81 = shalt.err (!%p78_p2)
}
   0x9   :  { %s82_s18 = scalar_lea.vmem %s16_s10, 256  ;;  %p87_p4 = scmp.lt.s32.totalorder %s16_s10, %s16_s10 }
   0xa   :  { %p83_p3 = scmp.ne.s32.totalorder %s16_s10, %s82_s18  ;;  %p88_p5 = scmp.lt.s32.totalorder %s82_s18, %s82_s18 }
   0xc   :  { %p89_p6 = por %p88_p5, %p87_p4 }
   0xe   :  { %p90_p7 = pnand %p89_p6, %p83_p3 }
  0x10   :  { %93 = shalt.err (!%p90_p7)
}
  0x11   :  { %s145_s19 = smov 128   ;;  %s146_s20 = smov 8  }
  0x12   :  { %21 = dma.hbm_to_vmem [thread:$0]  %s209_s0, 256, %s16_s10, [#allocation3], %s145_s19, %s145_s19, %s146_s20  }
  0x13   :  { %s147_s23 = smov [#allocation5]   ;;  %s94_s27 = scalar_lea.hbm %s210_s1, 256 }
  0x14   :  { %s27_s24 = sshll.u32 %s147_s23, 4  ;;  %p95_p8 = scmp.ne.s32.totalorder %s210_s1, %s94_s27  ;;  %s28_s24 = int_to_ptr.vmem [resolvable:$true] %s27_s24 }
  0x15   :  { %p98_p9 = scmp.lt.u32.totalorder %s94_s27, %s210_s1 }
  0x17   :  { %p100_p10 = pnand %p98_p9, %p95_p8 }
  0x19   :  { %103 = shalt.err (!%p100_p10)
}
  0x1a   :  { %s104_s4 = scalar_lea.vmem %s28_s24, 256  ;;  %p109_p12 = scmp.lt.s32.totalorder %s28_s24, %s28_s24 }
  0x1b   :  { %p105_p11 = scmp.ne.s32.totalorder %s28_s24, %s104_s4  ;;  %p110_p13 = scmp.lt.s32.totalorder %s104_s4, %s104_s4 }
  0x1d   :  { %p111_p0 = por %p110_p13, %p109_p12 }
  0x1f   :  { %p112_p1 = pnand %p111_p0, %p105_p11 }
  0x21   :  { %115 = shalt.err (!%p112_p1)
}
  0x22   :  { %33 = dma.hbm_to_vmem [thread:$0]  %s210_s1, 256, %s28_s24, [#allocation6], %s145_s19, %s145_s19, %s146_s20  }
  0x23   :  { %138 = dma.done.wait [#allocation3], 256  }
  0x24   :  { %139 = vsyncadd [#allocation3], 4294967040 }
  0x25   :  { %140 = dma.done.wait [#allocation6], 256  }
  0x26   :  { %141 = vsyncadd [#allocation6], 4294967040  ;;  %s148_s6 = smov [#allocation7]   ;;  %v40_v0 = vld [vmem:[#allocation2] sm:$0xff]  ;;  %v42_v1 = vld [vmem:[#allocation5] sm:$0xff]  ;;  %vm46_vm0 = vcmask 261120  }
  0x27   :  { %s54_s7 = sshll.u32 %s148_s6, 4  ;;  %v41_v2 = vld [vmem:[#allocation2 + $0x8] sm:$0xff]  ;;  %v44_v3 = vadd.f32 %v42_v1, %v40_v0  ;;  %v43_v4 = vld [vmem:[#allocation5 + $0x8] sm:$0xff]  ;;  %s55_s7 = int_to_ptr.vmem [resolvable:$true] %s54_s7 }
  0x28   :  { %v45_v5 = vadd.f32 %v43_v4, %v41_v2  ;;  %s116_s8 = scalar_lea.vmem %s55_s7, 256  ;;  %p121_p3 = scmp.lt.s32.totalorder %s55_s7, %s55_s7 }
  0x29   :  { %47 = vst.msk [vmem:[#allocation7] sm:$0xff] %vm46_vm0, %v44_v3  ;;  %p117_p2 = scmp.ne.s32.totalorder %s55_s7, %s116_s8  ;;  %p122_p4 = scmp.lt.s32.totalorder %s116_s8, %s116_s8 }
  0x2a   :  { %48 = vst.msk [vmem:[#allocation7 + $0x8] sm:$0xff] %vm46_vm0, %v45_v5 }
  0x2b   :  { %p123_p5 = por %p122_p4, %p121_p3 }
  0x2d   :  { %p124_p6 = pnand %p123_p5, %p117_p2 }
  0x2f   :  { %127 = shalt.err (!%p124_p6)
}
  0x30   :  { %s128_s10 = scalar_lea.hbm %s211_s2, 256 }
  0x31   :  { %p129_p7 = scmp.ne.s32.totalorder %s211_s2, %s128_s10  ;;  %p132_p8 = scmp.lt.u32.totalorder %s128_s10, %s211_s2 }
  0x33   :  { %p134_p9 = pnand %p132_p8, %p129_p7 }
  0x35   :  { %137 = shalt.err (!%p134_p9)
}
  0x36   :  { %60 = dma.vmem_to_hbm [thread:$0]  %s55_s7, 256, %s211_s2, [#allocation4], %s145_s19, %s145_s19, %s146_s20  }
  0x37   :  { %142 = dma.done.wait [#allocation4], 256  }
  0x38   :  { %143 = vsyncadd [#allocation4], 4294967040 }
  0x39   :  { %64 = vsyncpa [#allocation3], 1 }
  0x3a   :  { %65 = vsyncpa [#allocation6], 1 }
  0x3b   :  { %66 = vsyncpa [#allocation4], 1 }

</bundles_post_ra>
